<compile_context>
chip_gen: v7x
topology: tpu7x:2x2x1
jax: 0.10.0
libtpu: 0.0.40
codegen_flags: <defaults>
</compile_context>

<pallas_src>
import functools

import jax
import jax.numpy as jnp
from jax.experimental import pallas as pl
from jax.experimental.pallas import tpu as pltpu


def _mrao_kernel(*refs, coeffs):
    """acc = cur + sum_j coeffs[j] * hist[j], elementwise over one tile.

    refs = (cur_ref, hist_ref_0 .. hist_ref_{H-1}, out_ref); history refs are
    ordered oldest -> newest, matching `coeffs` (trace-time Python floats).
    """
    cur_ref = refs[0]
    hist_refs = refs[1:-1]
    out_ref = refs[-1]

    acc = cur_ref[...].astype(jnp.float32)
    for c, h_ref in zip(coeffs, hist_refs):        # static unroll, H <= 6
        acc = acc + jnp.float32(c) * h_ref[...].astype(jnp.float32)
    out_ref[...] = acc.astype(out_ref.dtype)


def extended_mrao(current_state, trajectory_history, *, window_size=5, gamma=0.85):
    """Pallas implementation of ExtendedMRAO.forward."""
    n_hist = len(trajectory_history)
    w_eff = min(window_size, n_hist - 1)
    if w_eff <= 0:
        # Mirrors the PyTorch early-return when there isn't enough history.
        return current_state

    dtype = current_state.dtype
    orig_shape = current_state.shape
    H = w_eff + 1

    # --- Telescoped coefficients (Python/trace-time floats), oldest -> newest:
    #   Psi_{t-1}            : +gamma
    #   Psi_{t-m}, m=2..W    : gamma^m - gamma^(m-1)
    #   Psi_{t-W-1} (oldest) : -gamma^W
    coeffs = tuple(
        [-(gamma ** w_eff)]
        + [gamma ** m - gamma ** (m - 1) for m in range(w_eff, 1, -1)]
        + [gamma]
    )
    # History tail the kernel needs, oldest -> newest (matches coeffs order).
    hist_list = [h.astype(dtype) for h in trajectory_history[-H:]]

    # --- Lane/sublane-dense slab layout ------------------------------------
    N = int(current_state.size)
    # Prefer a lane width that divides N exactly -> the reshape is free.
    lanes = next((c for c in (1024, 512, 256, 128) if N % c == 0), None)
    if lanes is None:
        # TODO(synk): non-128-multiple sizes take one pad copy per input here.
        lanes = min(512, 128 * (-(-N // 128)))
    rows = -(-N // lanes)
    padded = rows * lanes

    def to_slab(x):
        flat = jnp.reshape(x, (-1,))
        if padded != N:
            flat = jnp.pad(flat, (0, padded - N))
        return jnp.reshape(flat, (rows, lanes))

    cur_slab = to_slab(current_state)
    hist_slabs = [to_slab(h) for h in hist_list]

    # Row tile: ~512 KiB per stream per block. With (H+2) <= 8 streams and
    # double buffering that is ~8 MiB VMEM -> fits every generation's scoped
    # default while keeping the kernel DMA-limited (large, unmasked stores).
    itemsize = jnp.dtype(dtype).itemsize
    target_rows = max(8, (((512 * 1024) // (lanes * itemsize)) // 8) * 8)
    tr = rows if rows <= target_rows else target_rows
    grid = (pl.cdiv(rows, tr),)

    spec = pl.BlockSpec((tr, lanes), lambda i: (i, 0))

    out_slab = pl.pallas_call(
        functools.partial(_mrao_kernel, coeffs=coeffs),
        out_shape=jax.ShapeDtypeStruct((rows, lanes), dtype),
        grid=grid,
        in_specs=[spec] * (1 + H),
        out_specs=spec,
        compiler_params=pltpu.CompilerParams(
            dimension_semantics=("parallel",)),
    )(cur_slab, *hist_slabs)

    out_flat = jnp.reshape(out_slab, (padded,))
    if padded != N:
        out_flat = out_flat[:N]
    return jnp.reshape(out_flat, orig_shape)


def _reference(current_state, trajectory_history, window_size=5, gamma=0.85):
    """Pure-JAX reference mirroring the PyTorch forward exactly."""
    n_hist = len(trajectory_history)
    w_eff = min(window_size, n_hist - 1)
    if w_eff <= 0:
        return current_state
    window_sum = jnp.zeros_like(current_state)
    for k in range(w_eff):
        diff = trajectory_history[-(k + 1)] - trajectory_history[-(k + 2)]
        window_sum = window_sum + (gamma ** (k + 1)) * diff
    return current_state + window_sum


if __name__ == "__main__":
    key = jax.random.PRNGKey(0)

    B, D = 2, 256            # small shapes; D multiple of 128 -> free reshape path
    window_size = 5
    gamma = 0.85
    n_history = 7            # >= window_size + 1 -> full-window branch

    keys = jax.random.split(key, n_history + 1)
    current_state = jax.random.normal(keys[0], (B, D), dtype=jnp.float32)
    trajectory_history = [
        jax.random.normal(keys[i + 1], (B, D), dtype=jnp.float32)
        for i in range(n_history)
    ]

    # Full-window branch.
    out = jax.block_until_ready(
        extended_mrao(current_state, trajectory_history,
                      window_size=window_size, gamma=gamma))
    ref = _reference(current_state, trajectory_history, window_size, gamma)
    assert out.shape == current_state.shape and out.dtype == current_state.dtype
    assert jnp.allclose(out, ref, atol=1e-5, rtol=1e-5), "mismatch (full window)"

    # Truncated-window (short history) branch.
    short_hist = trajectory_history[:3]   # available_window = 2
    out_short = jax.block_until_ready(
        extended_mrao(current_state, short_hist,
                      window_size=window_size, gamma=gamma))
    ref_short = _reference(current_state, short_hist, window_size, gamma)
    assert jnp.allclose(out_short, ref_short, atol=1e-5, rtol=1e-5), \
        "mismatch (truncated window)"

    # Non-128-multiple feature dim -> exercises the padded-slab path.
    keys2 = jax.random.split(jax.random.PRNGKey(1), n_history + 1)
    cur2 = jax.random.normal(keys2[0], (B, 100), dtype=jnp.float32)
    hist2 = [jax.random.normal(keys2[i + 1], (B, 100), dtype=jnp.float32)
             for i in range(n_history)]
    out2 = jax.block_until_ready(
        extended_mrao(cur2, hist2, window_size=window_size, gamma=gamma))
    ref2 = _reference(cur2, hist2, window_size, gamma)
    assert jnp.allclose(out2, ref2, atol=1e-5, rtol=1e-5), "mismatch (padded path)"

    print("KERNEL_OK")
</pallas_src>

<mosaic_0001>
module attributes {stable_mosaic.version = 11 : i64} {
  func.func @_mrao_kernel(%arg0: i32, %arg1: memref<1x512xf32, #tpu.memory_space<vmem>>, %arg2: memref<1x512xf32, #tpu.memory_space<vmem>>, %arg3: memref<1x512xf32, #tpu.memory_space<vmem>>, %arg4: memref<1x512xf32, #tpu.memory_space<vmem>>, %arg5: memref<1x512xf32, #tpu.memory_space<vmem>>, %arg6: memref<1x512xf32, #tpu.memory_space<vmem>>, %arg7: memref<1x512xf32, #tpu.memory_space<vmem>>, %arg8: memref<1x512xf32, #tpu.memory_space<vmem>>) attributes {dimension_semantics = [#tpu.dimension_semantics<parallel>], iteration_bounds = array<i64: 1>, scalar_prefetch = 0 : i64, scratch_operands = 0 : i64, tpu.core_type = #tpu.core_type<tc>, window_params = [{transform_indices = @transform_0, window_bounds = array<i64: 1, 512>}, {transform_indices = @transform_1, window_bounds = array<i64: 1, 512>}, {transform_indices = @transform_2, window_bounds = array<i64: 1, 512>}, {transform_indices = @transform_3, window_bounds = array<i64: 1, 512>}, {transform_indices = @transform_4, window_bounds = array<i64: 1, 512>}, {transform_indices = @transform_5, window_bounds = array<i64: 1, 512>}, {transform_indices = @transform_6, window_bounds = array<i64: 1, 512>}, {transform_indices = @transform_7, window_bounds = array<i64: 1, 512>}]} {
    %c0 = arith.constant 0 : index
    %c0_0 = arith.constant 0 : index
    %0 = vector.load %arg1[%c0, %c0_0] : memref<1x512xf32, #tpu.memory_space<vmem>>, vector<1x512xf32>
    %c0_1 = arith.constant 0 : index
    %c0_2 = arith.constant 0 : index
    %1 = vector.load %arg2[%c0_1, %c0_2] : memref<1x512xf32, #tpu.memory_space<vmem>>, vector<1x512xf32>
    %cst = arith.constant -0.44370532 : f32
    %2 = vector.broadcast %cst : f32 to vector<1x512xf32>
    %3 = arith.mulf %2, %1 : vector<1x512xf32>
    %4 = arith.addf %0, %3 : vector<1x512xf32>
    %c0_3 = arith.constant 0 : index
    %c0_4 = arith.constant 0 : index
    %5 = vector.load %arg3[%c0_3, %c0_4] : memref<1x512xf32, #tpu.memory_space<vmem>>, vector<1x512xf32>
    %cst_5 = arith.constant -0.078300938 : f32
    %6 = vector.broadcast %cst_5 : f32 to vector<1x512xf32>
    %7 = arith.mulf %6, %5 : vector<1x512xf32>
    %8 = arith.addf %4, %7 : vector<1x512xf32>
    %c0_6 = arith.constant 0 : index
    %c0_7 = arith.constant 0 : index
    %9 = vector.load %arg4[%c0_6, %c0_7] : memref<1x512xf32, #tpu.memory_space<vmem>>, vector<1x512xf32>
    %cst_8 = arith.constant -0.0921187475 : f32
    %10 = vector.broadcast %cst_8 : f32 to vector<1x512xf32>
    %11 = arith.mulf %10, %9 : vector<1x512xf32>
    %12 = arith.addf %8, %11 : vector<1x512xf32>
    %c0_9 = arith.constant 0 : index
    %c0_10 = arith.constant 0 : index
    %13 = vector.load %arg5[%c0_9, %c0_10] : memref<1x512xf32, #tpu.memory_space<vmem>>, vector<1x512xf32>
    %cst_11 = arith.constant -1.083750e-01 : f32
    %14 = vector.broadcast %cst_11 : f32 to vector<1x512xf32>
    %15 = arith.mulf %14, %13 : vector<1x512xf32>
    %16 = arith.addf %12, %15 : vector<1x512xf32>
    %c0_12 = arith.constant 0 : index
    %c0_13 = arith.constant 0 : index
    %17 = vector.load %arg6[%c0_12, %c0_13] : memref<1x512xf32, #tpu.memory_space<vmem>>, vector<1x512xf32>
    %cst_14 = arith.constant -1.275000e-01 : f32
    %18 = vector.broadcast %cst_14 : f32 to vector<1x512xf32>
    %19 = arith.mulf %18, %17 : vector<1x512xf32>
    %20 = arith.addf %16, %19 : vector<1x512xf32>
    %c0_15 = arith.constant 0 : index
    %c0_16 = arith.constant 0 : index
    %21 = vector.load %arg7[%c0_15, %c0_16] : memref<1x512xf32, #tpu.memory_space<vmem>>, vector<1x512xf32>
    %cst_17 = arith.constant 8.500000e-01 : f32
    %22 = vector.broadcast %cst_17 : f32 to vector<1x512xf32>
    %23 = arith.mulf %22, %21 : vector<1x512xf32>
    %24 = arith.addf %20, %23 : vector<1x512xf32>
    %c0_18 = arith.constant 0 : index
    %c0_19 = arith.constant 0 : index
    %25 = vector.load %arg8[%c0_18, %c0_19] : memref<1x512xf32, #tpu.memory_space<vmem>>, vector<1x512xf32>
    tpu.vector_store %arg8[%c0_18, %c0_19], %24 {strides = array<i32>} : memref<1x512xf32, #tpu.memory_space<vmem>>, vector<1x512xf32>,
    return
  }
  func.func @transform_0(%arg0: i32) -> (i32, i32) {
    %c0_i32 = arith.constant 0 : i32
    %c0_i32_0 = arith.constant 0 : i32
    return %arg0, %c0_i32 : i32, i32
  }
  func.func @transform_1(%arg0: i32) -> (i32, i32) {
    %c0_i32 = arith.constant 0 : i32
    %c0_i32_0 = arith.constant 0 : i32
    return %arg0, %c0_i32 : i32, i32
  }
  func.func @transform_2(%arg0: i32) -> (i32, i32) {
    %c0_i32 = arith.constant 0 : i32
    %c0_i32_0 = arith.constant 0 : i32
    return %arg0, %c0_i32 : i32, i32
  }
  func.func @transform_3(%arg0: i32) -> (i32, i32) {
    %c0_i32 = arith.constant 0 : i32
    %c0_i32_0 = arith.constant 0 : i32
    return %arg0, %c0_i32 : i32, i32
  }
  func.func @transform_4(%arg0: i32) -> (i32, i32) {
    %c0_i32 = arith.constant 0 : i32
    %c0_i32_0 = arith.constant 0 : i32
    return %arg0, %c0_i32 : i32, i32
  }
  func.func @transform_5(%arg0: i32) -> (i32, i32) {
    %c0_i32 = arith.constant 0 : i32
    %c0_i32_0 = arith.constant 0 : i32
    return %arg0, %c0_i32 : i32, i32
  }
  func.func @transform_6(%arg0: i32) -> (i32, i32) {
    %c0_i32 = arith.constant 0 : i32
    %c0_i32_0 = arith.constant 0 : i32
    return %arg0, %c0_i32 : i32, i32
  }
  func.func @transform_7(%arg0: i32) -> (i32, i32) {
    %c0_i32 = arith.constant 0 : i32
    %c0_i32_0 = arith.constant 0 : i32
    return %arg0, %c0_i32 : i32, i32
  }
}

</mosaic_0001>

<bundles_post_ra>
// kernel: tpu_custom_call.1
= control target key start
LH: loop header
LB: loop body
LE: loop exit
PB: predicated region body
PF: predicated region fallthrough
CT: control target
= control target key end

     0   :  { %12 = vsyncpa [#allocation3], 0  ;;  %s260_s0 = inlined_call_operand.hbm [shape: f32[1,512], index: 0, kind: input, shape index: {}]   ;;  %s261_s1 = inlined_call_operand.hbm [shape: f32[1,512], index: 1, kind: input, shape index: {}]   ;;  %s262_s2 = inlined_call_operand.vmem [shape: f32[1,512], index: 2, kind: input, shape index: {}]   ;;  %s263_s3 = inlined_call_operand.vmem [shape: f32[1,512], index: 3, kind: input, shape index: {}]   ;;  %s264_s4 = inlined_call_operand.vmem [shape: f32[1,512], index: 4, kind: input, shape index: {}]   ;;  %s265_s5 = inlined_call_operand.vmem [shape: f32[1,512], index: 5, kind: input, shape index: {}]   ;;  %s266_s6 = inlined_call_operand.vmem [shape: f32[1,512], index: 6, kind: input, shape index: {}]   ;;  %s267_s7 = inlined_call_operand.hbm [shape: f32[1,512], index: 7, kind: output, shape index: {}]  }
   0x1   :  { %13 = vsyncpa [#allocation6], 0 }
   0x2   :  { %14 = vsyncpa [#allocation4], 0  ;;  %s166_s24 = smov [#allocation2]   ;;  %s167_s26 = smov [#allocation5]  }
   0x3   :  { %s21_s25 = sshll.u32 %s166_s24, 4  ;;  %s31_s27 = sshll.u32 %s167_s26, 4  ;;  %s22_s25 = int_to_ptr.vmem [resolvable:$true] %s21_s25  ;;  %s32_s27 = int_to_ptr.vmem [resolvable:$true] %s31_s27 }
   0x4   :  { %s94_s30 = scalar_lea.hbm %s260_s0, 64 }
   0x5   :  { %p95_p0 = scmp.ne.s32.totalorder %s260_s0, %s94_s30  ;;  %p98_p1 = scmp.lt.u32.totalorder %s94_s30, %s260_s0 }
   0x7   :  { %p100_p2 = pnand %p98_p1, %p95_p0 }
   0x9   :  { %103 = shalt.err (!%p100_p2)
}
   0xa   :  { %s104_s12 = scalar_lea.vmem %s22_s25, 64  ;;  %p109_p4 = scmp.lt.s32.totalorder %s22_s25, %s22_s25 }
   0xb   :  { %p105_p3 = scmp.ne.s32.totalorder %s22_s25, %s104_s12  ;;  %p110_p5 = scmp.lt.s32.totalorder %s104_s12, %s104_s12 }
   0xd   :  { %p111_p6 = por %p110_p5, %p109_p4 }
   0xf   :  { %p112_p7 = pnand %p111_p6, %p105_p3 }
  0x11   :  { %115 = shalt.err (!%p112_p7)
}
  0x12   :  { %24 = dma.hbm_to_vmem [thread:$0]  %s260_s0, 64, %s22_s25, [#allocation3]  }
  0x13   :  { %s116_s17 = scalar_lea.hbm %s261_s1, 64 }
  0x14   :  { %p117_p8 = scmp.ne.s32.totalorder %s261_s1, %s116_s17  ;;  %p120_p9 = scmp.lt.u32.totalorder %s116_s17, %s261_s1 }
  0x16   :  { %p122_p10 = pnand %p120_p9, %p117_p8 }
  0x18   :  { %125 = shalt.err (!%p122_p10)
}
  0x19   :  { %s126_s22 = scalar_lea.vmem %s32_s27, 64  ;;  %p131_p12 = scmp.lt.s32.totalorder %s32_s27, %s32_s27 }
  0x1a   :  { %p127_p11 = scmp.ne.s32.totalorder %s32_s27, %s126_s22  ;;  %p132_p13 = scmp.lt.s32.totalorder %s126_s22, %s126_s22 }
  0x1c   :  { %p133_p0 = por %p132_p13, %p131_p12 }
  0x1e   :  { %p134_p1 = pnand %p133_p0, %p127_p11 }
  0x20   :  { %137 = shalt.err (!%p134_p1)
}
  0x21   :  { %34 = dma.hbm_to_vmem [thread:$0]  %s261_s1, 64, %s32_s27, [#allocation6]  }
  0x22   :  { %160 = dma.done.wait [#allocation3], 64  }
  0x23   :  { %161 = vsyncadd [#allocation3], 4294967232 }
  0x24   :  { %162 = dma.done.wait [#allocation6], 64  }
  0x25   :  { %163 = vsyncadd [#allocation6], 4294967232  ;;  %v51_v0 = vld [vmem:[#allocation2] sm:$0xf]  ;;  %v52_v1 = vld [vmem:[#allocation5] sm:$0xf]  ;;  %v70_v15 = vlaneseq }
  0x26   :  { %v55_v2 = vld [vmem:[%s262_s2] sm:$0xf]  ;;  %v53_v3 = vmul.f32 -0.44370532, %v52_v1 }
  0x27   :  { %v56_v4 = vmul.f32 -0.07830094, %v55_v2  ;;  %v58_v5 = vld [vmem:[%s263_s3] sm:$0xf]  ;;  %s168_s3 = smov [#allocation7]   ;;  %vm72_vm0 = vcmp.lt.s32.totalorder %v70_v15, 512 }
  0x28   :  { %v61_v6 = vld [vmem:[%s264_s4] sm:$0xf]  ;;  %v54_v7 = vadd.f32 %v53_v3, %v51_v0  ;;  %v59_v8 = vmul.f32 -0.09211875, %v58_v5  ;;  %s81_s9 = sshll.u32 %s168_s3, 4  ;;  %s82_s9 = int_to_ptr.vmem [resolvable:$true] %s81_s9 }
  0x29   :  { %v64_v9 = vld [vmem:[%s265_s5] sm:$0xf]  ;;  %v62_v11 = vmul.f32 -0.108375, %v61_v6  ;;  %s138_s4 = scalar_lea.vmem %s82_s9, 64  ;;  %p143_p3 = scmp.lt.s32.totalorder %s82_s9, %s82_s9 }
  0x2a   :  { %v57_v10 = vadd.f32 %v56_v4, %v54_v7  ;;  %v67_v12 = vld [vmem:[%s266_s6] sm:$0xf]  ;;  %v65_v14 = vmul.f32 -0.1275, %v64_v9  ;;  %p139_p2 = scmp.ne.s32.totalorder %s82_s9, %s138_s4  ;;  %p144_p4 = scmp.lt.s32.totalorder %s138_s4, %s138_s4 }
  0x2b   :  { %v68_v17 = vmul.f32 0.85, %v67_v12 }
  0x2c   :  { %v60_v13 = vadd.f32 %v59_v8, %v57_v10  ;;  %p145_p5 = por %p144_p4, %p143_p3 }
  0x2e   :  { %v63_v16 = vadd.f32 %v62_v11, %v60_v13  ;;  %p146_p6 = pnand %p145_p5, %p139_p2 }
  0x30   :  { %v66_v18 = vadd.f32 %v65_v14, %v63_v16 }
  0x32   :  { %v69_v19 = vadd.f32 %v68_v17, %v66_v18 }
  0x34   :  { %74 = vst.msk [vmem:[#allocation7] sm:$0xf] %vm72_vm0, %v69_v19 }
  0x35   :  { %149 = shalt.err (!%p146_p6)
}
  0x36   :  { %s150_s10 = scalar_lea.hbm %s267_s7, 64 }
  0x37   :  { %p151_p7 = scmp.ne.s32.totalorder %s267_s7, %s150_s10  ;;  %p154_p8 = scmp.lt.u32.totalorder %s150_s10, %s267_s7 }
  0x39   :  { %p156_p9 = pnand %p154_p8, %p151_p7 }
  0x3b   :  { %159 = shalt.err (!%p156_p9)
}
  0x3c   :  { %84 = dma.vmem_to_hbm [thread:$0]  %s82_s9, 64, %s267_s7, [#allocation4]  }
  0x3d   :  { %164 = dma.done.wait [#allocation4], 64  }
  0x3e   :  { %165 = vsyncadd [#allocation4], 4294967232 }
  0x3f   :  { %88 = vsyncpa [#allocation3], 1 }
  0x40   :  { %89 = vsyncpa [#allocation6], 1 }
  0x41   :  { %90 = vsyncpa [#allocation4], 1 }

</bundles_post_ra>
